<compile_context>
chip_gen: v7x
topology: tpu7x:2x2x1
jax: 0.10.0
libtpu: 0.0.40
codegen_flags: <defaults>
</compile_context>

<pallas_src>
import numpy as np
import jax
import jax.numpy as jnp
from jax.experimental import pallas as pl
from jax.experimental.pallas import tpu as pltpu


def _leaky_relu(x, slope=0.01):
    # matches torch.nn.LeakyReLU default negative_slope=0.01
    return jnp.maximum(x, slope * x)


def _round_up(x, m):
    return ((x + m - 1) // m) * m


def _block_diag(w, p):
    """[a, b] -> [p*a, p*b] block-diagonal with p copies of w."""
    return jnp.kron(jnp.eye(p, dtype=w.dtype), w)


# ----------------------------- Pallas kernel ------------------------------ #
def encoder_embed_kernel(theta_ref, dyn_ref, w1_ref, b1_ref, w2_ref, b2_ref,
                         static_ref, out_ref):
    theta = theta_ref[0, 0]
    # embedding_transform: Linear(d_in -> M) + LeakyReLU
    h = jnp.dot(dyn_ref[...], w1_ref[...],
                preferred_element_type=jnp.float32) + b1_ref[...]
    h = _leaky_relu(h)
    # spatial_transform: Linear(M -> E) + LeakyReLU
    y = jnp.dot(h.astype(w2_ref.dtype), w2_ref[...],
                preferred_element_type=jnp.float32) + b2_ref[...]
    y = _leaky_relu(y)
    # theta blend with static node embedding table
    out_ref[...] = theta * static_ref[...] + (1.0 - theta) * y


def encoder_embeddings_pallas(theta, dyn, w1, b1, w2, b2, static_w, *,
                              tn=256, use_bf16=False, pack_lanes=True):
    """dyn: [N, d_in], w1: [d_in, M], w2: [M, E], static_w: [N, E] -> [N, E]."""
    N, d_in = dyn.shape
    M = w1.shape[1]
    E = w2.shape[1]
    theta = jnp.asarray(theta, jnp.float32).reshape(1, 1)

    # ---- lane-density packing (wrapper-side only; kernel body unchanged) ----
    p = 1
    if pack_lanes and E < 128 and 128 % E == 0:
        p = 128 // E
    if p > 1:
        w1 = _block_diag(w1, p)          # [p*d_in, p*M]
        w2 = _block_diag(w2, p)          # [p*M,   p*E ]
        b1 = jnp.tile(b1, (1, p))
        b2 = jnp.tile(b2, (1, p))
    d_in_p, M_p, E_p = p * d_in, p * M, p * E

    # ---- row padding / tiling (in the packed row space) ----
    R = -(-N // p)                        # packed rows before tile padding
    tr = min(int(tn), _round_up(R, 8))    # row tile, multiple of 8
    R_pad = _round_up(R, tr)
    N_pad = R_pad * p
    if N_pad != N:
        dyn = jnp.pad(dyn, ((0, N_pad - N), (0, 0)))
        static_w = jnp.pad(static_w, ((0, N_pad - N), (0, 0)))
    dyn_p = dyn.reshape(R_pad, d_in_p)            # free row-major reshape
    static_p = static_w.reshape(R_pad, E_p)       # free row-major reshape

    if use_bf16:  # v6e/v7x MXU fast path; accumulation stays f32
        dyn_p = dyn_p.astype(jnp.bfloat16)
        w1 = w1.astype(jnp.bfloat16)
        w2 = w2.astype(jnp.bfloat16)

    grid = (R_pad // tr,)

    # VMEM budget: double-buffered streamed tiles + single-buffered weights.
    item_s = 2 if use_bf16 else 4
    stream_bytes = 2 * tr * (d_in_p * item_s + 2 * E_p * 4)
    weight_bytes = (d_in_p * M_p + M_p * E_p) * item_s + (M_p + E_p) * 4
    vmem_limit = int(min(64 * 1024 * 1024,
                         max(32 * 1024 * 1024,
                             2 * (stream_bytes + weight_bytes))))

    # TODO(synk): if d_in (= memory_dimension * lamb_len) grows large enough to
    # pressure VMEM, add a trailing "arbitrary" K grid axis + VMEM accumulator.
    out_p = pl.pallas_call(
        encoder_embed_kernel,
        out_shape=jax.ShapeDtypeStruct((R_pad, E_p), jnp.float32),
        grid_spec=pltpu.PrefetchScalarGridSpec(
            num_scalar_prefetch=0,
            grid=grid,
            in_specs=[
                # theta scalar lives in SMEM (untiled)
                pl.BlockSpec(memory_space=pltpu.MemorySpace.SMEM),
                pl.BlockSpec((tr, d_in_p), lambda i: (i, 0)),      # dyn tile
                pl.BlockSpec((d_in_p, M_p), lambda i: (0, 0),
                             pipeline_mode=pl.Buffered(1)),        # W1 (resident)
                pl.BlockSpec((1, M_p), lambda i: (0, 0),
                             pipeline_mode=pl.Buffered(1)),        # b1
                pl.BlockSpec((M_p, E_p), lambda i: (0, 0),
                             pipeline_mode=pl.Buffered(1)),        # W2 (resident)
                pl.BlockSpec((1, E_p), lambda i: (0, 0),
                             pipeline_mode=pl.Buffered(1)),        # b2
                pl.BlockSpec((tr, E_p), lambda i: (i, 0)),         # static tile
            ],
            out_specs=pl.BlockSpec((tr, E_p), lambda i: (i, 0)),
        ),
        compiler_params=pltpu.CompilerParams(
            dimension_semantics=("parallel",),
            vmem_limit_bytes=vmem_limit),
    )(theta, dyn_p, w1, b1, w2, b2, static_p)

    return out_p.reshape(N_pad, E)[:N]


def encoder_embeddings_ref(theta, dyn, w1, b1, w2, b2, static_w):
    """Pure-JAX reference of the fused hot path."""
    h = _leaky_relu(dyn @ w1 + b1)
    y = _leaky_relu(h @ w2 + b2)
    th = jnp.asarray(theta, jnp.float32).reshape(())
    return th * static_w + (1.0 - th) * y


# --------------------------- Encoder (JAX glue) ---------------------------- #
class EncoderJAX:
    def __init__(self, n_nodes, node_features, embedding_dimension,
                 memory_dimension, message_dimension, lambs, output,
                 init_lamb=0.5, key=None):
        self.n_nodes = n_nodes
        self.node_features = node_features                       # [N, F]
        self.embedding_dimension = embedding_dimension
        self.memory_dimension = memory_dimension
        self.message_dimension = message_dimension
        self.output = output
        self.lambs = jnp.asarray(lambs, jnp.float32) * output
        self.lamb_len = self.lambs.shape[0]
        self.queue_length = 48
        self.raw_message_dimension = (2 * memory_dimension * self.lamb_len
                                      + node_features.shape[1] + 1)

        key = jax.random.PRNGKey(0) if key is None else key
        k_mem, k_static, k_w1, k_b1, k_w2, k_b2 = jax.random.split(key, 6)

        d_in = memory_dimension * self.lamb_len
        # ExpMemory_lambs state (identity embedding => memory rows are the
        # node embeddings). Initialized deterministically (synthetic).
        self.memory = 0.1 * jax.random.normal(
            k_mem, (n_nodes, d_in), jnp.float32)
        self.embedding_memory = jnp.zeros(
            (n_nodes, self.queue_length, memory_dimension), jnp.float32)

        self.theta = jnp.full((1, 1), init_lamb, jnp.float32)     # nn.Parameter([init_lamb])
        self.static_embedding_weight = jax.random.normal(
            k_static, (n_nodes, embedding_dimension), jnp.float32)

        # embedding_transform: Linear(M*L -> M)
        lim1 = 1.0 / np.sqrt(d_in)
        self.w1 = jax.random.uniform(k_w1, (d_in, memory_dimension),
                                     jnp.float32, -lim1, lim1)
        self.b1 = jax.random.uniform(k_b1, (1, memory_dimension),
                                     jnp.float32, -lim1, lim1)
        # spatial_transform: Linear(M -> E)
        lim2 = 1.0 / np.sqrt(memory_dimension)
        self.w2 = jax.random.uniform(k_w2, (memory_dimension, embedding_dimension),
                                     jnp.float32, -lim2, lim2)
        self.b2 = jax.random.uniform(k_b2, (1, embedding_dimension),
                                     jnp.float32, -lim2, lim2)

    def get_raw_messages(self, source_nodes, source_embeddings,
                         target_embeddings, node_features, edge_times):
        # faithful to the PyTorch concat; the per-node dict grouping
        # (np.unique + boolean masks) is host-side bookkeeping.
        ones = jnp.ones((target_embeddings.shape[0], 1), jnp.float32)
        source_message = jnp.concatenate(
            [source_embeddings, target_embeddings, node_features, ones], axis=1)
        messages = {}
        unique_nodes = np.unique(np.asarray(source_nodes))
        src = np.asarray(source_nodes)
        for node_i in unique_nodes:
            ind = np.arange(source_message.shape[0])[src == node_i]
            messages[int(node_i)] = [source_message[ind], edge_times[ind]]
        return messages

    def forward(self, source_nodes, target_nodes, timestamps, now_time,
                od_matrix, predict_ind):
        memory = self.memory                                           # get_memory()
        source_embeddings = memory[source_nodes]                       # identity embedding
        target_embeddings = memory[target_nodes]

        raw_messages = self.get_raw_messages(
            source_nodes, source_embeddings, target_embeddings,
            self.node_features[target_nodes], timestamps)
        del raw_messages
        # TODO(synk): exp_lambs message aggregator, MLP message function and the
        # exponential memory updater are external factories not defined in the
        # reference snippet; memory is passed through unchanged here.
        updated_memory = memory

        recent_node_embeddings = updated_memory.reshape(self.n_nodes, -1)
        dynamic_embeddings = recent_node_embeddings                     # [N, M*L]

        embeddings = encoder_embeddings_pallas(
            self.theta, dynamic_embeddings, self.w1, self.b1, self.w2,
            self.b2, self.static_embedding_weight)
        return embeddings, self.node_features

    # pure-JAX reference for verification of the Pallas hot path
    def forward_reference(self, *args):
        dyn = self.memory.reshape(self.n_nodes, -1)
        return encoder_embeddings_ref(self.theta, dyn, self.w1, self.b1,
                                      self.w2, self.b2,
                                      self.static_embedding_weight)


# ---------------------------------- main ----------------------------------- #
if __name__ == "__main__":
    key = jax.random.PRNGKey(0)
    k_feat, k_params, k_src, k_dst, k_ts, k_big = jax.random.split(key, 6)

    # ---- Encoder forward at the module's natural (small) shapes ----
    n_nodes = 16
    node_feat_dim = 8
    embedding_dimension = 64
    memory_dimension = 32
    message_dimension = 32
    lambs = [0.1, 1.0]
    batch = 8

    node_features = jax.random.normal(k_feat, (n_nodes, node_feat_dim), jnp.float32)
    enc = EncoderJAX(n_nodes, node_features, embedding_dimension,
                     memory_dimension, message_dimension, lambs,
                     output=1.0, init_lamb=0.5, key=k_params)

    source_nodes = np.asarray(
        jax.random.randint(k_src, (batch,), 0, n_nodes), np.int32)
    target_nodes = np.asarray(
        jax.random.randint(k_dst, (batch,), 0, n_nodes), np.int32)
    timestamps = jax.random.uniform(k_ts, (batch,), jnp.float32, 0.0, 100.0)
    now_time = 100.0
    od_matrix = jnp.zeros((n_nodes, n_nodes), jnp.float32)
    predict_ind = 0

    embeddings, feats = enc.forward(source_nodes, target_nodes, timestamps,
                                    now_time, od_matrix, predict_ind)
    embeddings = jax.block_until_ready(embeddings)

    ref = enc.forward_reference()
    np.testing.assert_allclose(np.asarray(embeddings), np.asarray(ref),
                               rtol=1e-5, atol=1e-5)
    assert embeddings.shape == (n_nodes, embedding_dimension)
    assert feats.shape == (n_nodes, node_feat_dim)

    # ---- extra check: padded N, multi-tile grid, lane-packed path ----
    N2, d_in2, M2, E2 = 200, 96, 40, 64
    ks = jax.random.split(k_big, 6)
    dyn2 = jax.random.normal(ks[0], (N2, d_in2), jnp.float32)
    w1_2 = jax.random.normal(ks[1], (d_in2, M2), jnp.float32) * 0.1
    b1_2 = jax.random.normal(ks[2], (1, M2), jnp.float32) * 0.1
    w2_2 = jax.random.normal(ks[3], (M2, E2), jnp.float32) * 0.1
    b2_2 = jax.random.normal(ks[4], (1, E2), jnp.float32) * 0.1
    st_2 = jax.random.normal(ks[5], (N2, E2), jnp.float32)
    th_2 = jnp.full((1, 1), 0.3, jnp.float32)

    got = encoder_embeddings_pallas(th_2, dyn2, w1_2, b1_2, w2_2, b2_2, st_2,
                                    tn=32)  # forces a 4-step grid + row padding
    got = jax.block_until_ready(got)
    want = encoder_embeddings_ref(th_2, dyn2, w1_2, b1_2, w2_2, b2_2, st_2)
    np.testing.assert_allclose(np.asarray(got), np.asarray(want),
                               rtol=1e-4, atol=1e-4)

    print("KERNEL_OK")
</pallas_src>

<mosaic_0001>
module attributes {stable_mosaic.version = 11 : i64} {
  func.func @encoder_embed_kernel(%arg0: i32, %arg1: memref<1x1xf32, #tpu.memory_space<smem>>, %arg2: memref<8x128xf32, #tpu.memory_space<vmem>>, %arg3: memref<128x64xf32, #tpu.memory_space<vmem>>, %arg4: memref<1x64xf32, #tpu.memory_space<vmem>>, %arg5: memref<64x128xf32, #tpu.memory_space<vmem>>, %arg6: memref<1x128xf32, #tpu.memory_space<vmem>>, %arg7: memref<8x128xf32, #tpu.memory_space<vmem>>, %arg8: memref<8x128xf32, #tpu.memory_space<vmem>>) attributes {dimension_semantics = [#tpu.dimension_semantics<parallel>], iteration_bounds = array<i64: 1>, scalar_prefetch = 0 : i64, scratch_operands = 0 : i64, tpu.core_type = #tpu.core_type<tc>, window_params = [{transform_indices = @transform_0, window_bounds = array<i64: 1, 1>}, {transform_indices = @transform_1, window_bounds = array<i64: 8, 128>}, {pipeline_mode = #tpu.pipeline_mode<synchronous>, transform_indices = @transform_2, window_bounds = array<i64: 128, 64>}, {pipeline_mode = #tpu.pipeline_mode<synchronous>, transform_indices = @transform_3, window_bounds = array<i64: 1, 64>}, {pipeline_mode = #tpu.pipeline_mode<synchronous>, transform_indices = @transform_4, window_bounds = array<i64: 64, 128>}, {pipeline_mode = #tpu.pipeline_mode<synchronous>, transform_indices = @transform_5, window_bounds = array<i64: 1, 128>}, {transform_indices = @transform_6, window_bounds = array<i64: 8, 128>}, {transform_indices = @transform_7, window_bounds = array<i64: 8, 128>}]} {
    %c0 = arith.constant 0 : index
    %c0_0 = arith.constant 0 : index
    %0 = memref.load %arg1[%c0, %c0_0] : memref<1x1xf32, #tpu.memory_space<smem>>
    %c0_1 = arith.constant 0 : index
    %c0_2 = arith.constant 0 : index
    %1 = vector.load %arg2[%c0_1, %c0_2] : memref<8x128xf32, #tpu.memory_space<vmem>>, vector<8x128xf32>
    %c0_3 = arith.constant 0 : index
    %c0_4 = arith.constant 0 : index
    %2 = vector.load %arg3[%c0_3, %c0_4] : memref<128x64xf32, #tpu.memory_space<vmem>>, vector<128x64xf32>
    %cst = arith.constant dense<0.000000e+00> : vector<8x64xf32>
    %3 = tpu.matmul %1, %2, %cst {dimension_numbers = #tpu.dot_dimension_numbers<[1], [0], [0], [1], [0, 0, 1, 1], [], []>} : vector<8x128xf32>, vector<128x64xf32>, vector<8x64xf32> -> vector<8x64xf32>
    %c0_5 = arith.constant 0 : index
    %c0_6 = arith.constant 0 : index
    %4 = vector.load %arg4[%c0_5, %c0_6] : memref<1x64xf32, #tpu.memory_space<vmem>>, vector<1x64xf32>
    %5 = vector.broadcast %4 : vector<1x64xf32> to vector<8x64xf32>
    %6 = arith.addf %3, %5 : vector<8x64xf32>
    %cst_7 = arith.constant 0.00999999977 : f32
    %7 = vector.broadcast %cst_7 : f32 to vector<8x64xf32>
    %8 = arith.mulf %7, %6 : vector<8x64xf32>
    %9 = arith.maximumf %6, %8 : vector<8x64xf32>
    %c0_8 = arith.constant 0 : index
    %c0_9 = arith.constant 0 : index
    %10 = vector.load %arg5[%c0_8, %c0_9] : memref<64x128xf32, #tpu.memory_space<vmem>>, vector<64x128xf32>
    %cst_10 = arith.constant dense<0.000000e+00> : vector<8x128xf32>
    %11 = tpu.matmul %9, %10, %cst_10 {dimension_numbers = #tpu.dot_dimension_numbers<[1], [0], [0], [1], [0, 0, 1, 1], [], []>} : vector<8x64xf32>, vector<64x128xf32>, vector<8x128xf32> -> vector<8x128xf32>
    %c0_11 = arith.constant 0 : index
    %c0_12 = arith.constant 0 : index
    %12 = vector.load %arg6[%c0_11, %c0_12] : memref<1x128xf32, #tpu.memory_space<vmem>>, vector<1x128xf32>
    %13 = vector.broadcast %12 : vector<1x128xf32> to vector<8x128xf32>
    %14 = arith.addf %11, %13 : vector<8x128xf32>
    %cst_13 = arith.constant 0.00999999977 : f32
    %15 = vector.broadcast %cst_13 : f32 to vector<8x128xf32>
    %16 = arith.mulf %15, %14 : vector<8x128xf32>
    %17 = arith.maximumf %14, %16 : vector<8x128xf32>
    %c0_14 = arith.constant 0 : index
    %c0_15 = arith.constant 0 : index
    %18 = vector.load %arg7[%c0_14, %c0_15] : memref<8x128xf32, #tpu.memory_space<vmem>>, vector<8x128xf32>
    %19 = vector.broadcast %0 : f32 to vector<8x128xf32>
    %20 = arith.mulf %19, %18 : vector<8x128xf32>
    %cst_16 = arith.constant 1.000000e+00 : f32
    %21 = arith.subf %cst_16, %0 : f32
    %22 = vector.broadcast %21 : f32 to vector<8x128xf32>
    %23 = arith.mulf %22, %17 : vector<8x128xf32>
    %24 = arith.addf %20, %23 : vector<8x128xf32>
    %c0_17 = arith.constant 0 : index
    %c0_18 = arith.constant 0 : index
    %25 = vector.load %arg8[%c0_17, %c0_18] : memref<8x128xf32, #tpu.memory_space<vmem>>, vector<8x128xf32>
    tpu.vector_store %arg8[%c0_17, %c0_18], %24 {strides = array<i32>} : memref<8x128xf32, #tpu.memory_space<vmem>>, vector<8x128xf32>,
    return
  }
  func.func @transform_0(%arg0: i32) -> (i32, i32) {
    %c0_i32 = arith.constant 0 : i32
    %c0_i32_0 = arith.constant 0 : i32
    %c0_i32_1 = arith.constant 0 : i32
    return %c0_i32, %c0_i32_0 : i32, i32
  }
  func.func @transform_1(%arg0: i32) -> (i32, i32) {
    %c0_i32 = arith.constant 0 : i32
    %c0_i32_0 = arith.constant 0 : i32
    return %arg0, %c0_i32 : i32, i32
  }
  func.func @transform_2(%arg0: i32) -> (i32, i32) {
    %c0_i32 = arith.constant 0 : i32
    %c0_i32_0 = arith.constant 0 : i32
    %c0_i32_1 = arith.constant 0 : i32
    return %c0_i32, %c0_i32_0 : i32, i32
  }
  func.func @transform_3(%arg0: i32) -> (i32, i32) {
    %c0_i32 = arith.constant 0 : i32
    %c0_i32_0 = arith.constant 0 : i32
    %c0_i32_1 = arith.constant 0 : i32
    return %c0_i32, %c0_i32_0 : i32, i32
  }
  func.func @transform_4(%arg0: i32) -> (i32, i32) {
    %c0_i32 = arith.constant 0 : i32
    %c0_i32_0 = arith.constant 0 : i32
    %c0_i32_1 = arith.constant 0 : i32
    return %c0_i32, %c0_i32_0 : i32, i32
  }
  func.func @transform_5(%arg0: i32) -> (i32, i32) {
    %c0_i32 = arith.constant 0 : i32
    %c0_i32_0 = arith.constant 0 : i32
    %c0_i32_1 = arith.constant 0 : i32
    return %c0_i32, %c0_i32_0 : i32, i32
  }
  func.func @transform_6(%arg0: i32) -> (i32, i32) {
    %c0_i32 = arith.constant 0 : i32
    %c0_i32_0 = arith.constant 0 : i32
    return %arg0, %c0_i32 : i32, i32
  }
  func.func @transform_7(%arg0: i32) -> (i32, i32) {
    %c0_i32 = arith.constant 0 : i32
    %c0_i32_0 = arith.constant 0 : i32
    return %arg0, %c0_i32 : i32, i32
  }
}

</mosaic_0001>

<bundles_post_ra>
// kernel: tpu_custom_call.1
= control target key start
LH: loop header
LB: loop body
LE: loop exit
PB: predicated region body
PF: predicated region fallthrough
CT: control target
= control target key end

     0   :  { %v385_v3 = vmov 0.0|0.0   ;;  %vm386_vm0 = vmmov 0   ;;  %v387_v6 = vmov 0.0   ;;  %s531_s0 = inlined_call_operand.<no memory space> [shape: f32[1,1], index: 0, kind: input, shape index: {}]   ;;  %s532_s1 = inlined_call_operand.vmem [shape: f32[8,128], index: 1, kind: input, shape index: {}]   ;;  %s533_s2 = inlined_call_operand.vmem [shape: f32[128,64], index: 2, kind: input, shape index: {}]   ;;  %s534_s3 = inlined_call_operand.vmem [shape: f32[1,64], index: 3, kind: input, shape index: {}]   ;;  %s535_s4 = inlined_call_operand.vmem [shape: f32[64,128], index: 4, kind: input, shape index: {}]   ;;  %s536_s5 = inlined_call_operand.vmem [shape: f32[1,128], index: 5, kind: input, shape index: {}]   ;;  %s537_s6 = inlined_call_operand.vmem [shape: f32[8,128], index: 6, kind: input, shape index: {}]   ;;  %s538_s7 = inlined_call_operand.hbm [shape: f32[8,128], index: 7, kind: output, shape index: {}]  }
   0x1   :  { %v30_v0 = vld [vmem:[%s533_s2] sm:$0xff]  ;;  %v31_v1 = vld [vmem:[%s533_s2 + $0x8] sm:$0xff]  ;;  %v32_v2 = vld [vmem:[%s533_s2 + $0x10] sm:$0xff]  ;;  %321 = vmatprep.subr.bf16.mxu0 %v385_v3  ;;  %299 = vmatprep.mubr.msk.f32.mxu0 %vm386_vm0, %v387_v6 }
   0x2   :  { %v322_v4 = vpack.c.bf16 %v31_v1, %v30_v0  ;;  %v33_v5 = vld [vmem:[%s533_s2 + $0x18] sm:$0xff]  ;;  %345 = vmatprep.subr.bf16.mxu1 %v385_v3  ;;  %318 = vmatprep.mubr.msk.f32.mxu1 %vm386_vm0, %v387_v6  ;;  %v34_v8 = vld [vmem:[%s533_s2 + $0x20] sm:$0xff]  ;;  %v35_v9 = vld [vmem:[%s533_s2 + $0x28] sm:$0xff] }
   0x3   :  { %v325_v7 = vpack.c.bf16 %v33_v5, %v32_v2  ;;  %v125_v10 = vld [vmem:[%s535_s4] sm:$0xff]  ;;  %v126_v11 = vld [vmem:[%s535_s4 + $0x8] sm:$0xff]  ;;  %v127_v12 = vld [vmem:[%s535_s4 + $0x10] sm:$0xff]  ;;  %v328_v14 = vpack.c.bf16 %v35_v9, %v34_v8 }
   0x4   :  { %323 = vmatpush3.bf16.msra.mxu0 %v322_v4  ;;  %v128_v13 = vld [vmem:[%s535_s4 + $0x18] sm:$0xff]  ;;  %v346_v15 = vpack.c.bf16 %v126_v11, %v125_v10 }
   0x5   :  { %324 = vmatprep.subr.bf16.mxu0 %v385_v3 }
   0x8   :  { %326 = vmatpush3.bf16.msra.mxu0 %v325_v7 }
   0x9   :  { %13 = vsyncpa [#allocation4], 0  ;;  %327 = vmatprep.subr.bf16.mxu0 %v385_v3  ;;  %v36_v16 = vld [vmem:[%s533_s2 + $0x30] sm:$0xff]  ;;  %v37_v17 = vld [vmem:[%s533_s2 + $0x38] sm:$0xff]  ;;  %347 = vmatpush3.bf16.msra.mxu1 %v346_v15  ;;  %v349_v18 = vpack.c.bf16 %v128_v13, %v127_v12  ;;  %vm140_vm1 = vcmask 523264   ;;  %s219_s8 = ssub.f32 1.0, %s531_s0  ;;  %v217_v50 = vstv %s531_s0 }
   0xa   :  { %348 = vmatprep.subr.bf16.mxu1 %v385_v3  ;;  %v331_v19 = vpack.c.bf16 %v37_v17, %v36_v16  ;;  %v38_v20 = vld [vmem:[%s533_s2 + $0x40] sm:$0xff]  ;;  %v39_v21 = vld [vmem:[%s533_s2 + $0x48] sm:$0xff]  ;;  %v40_v23 = vld [vmem:[%s533_s2 + $0x50] sm:$0xff] }
   0xb   :  { %v334_v22 = vpack.c.bf16 %v39_v21, %v38_v20  ;;  %v41_v24 = vld [vmem:[%s533_s2 + $0x58] sm:$0xff]  ;;  %v42_v26 = vld [vmem:[%s533_s2 + $0x60] sm:$0xff]  ;;  %v43_v27 = vld [vmem:[%s533_s2 + $0x68] sm:$0xff]  ;;  %v220_v52 = vstv %s219_s8 }
   0xc   :  { %329 = vmatpush3.bf16.msra.mxu0 %v328_v14  ;;  %v337_v25 = vpack.c.bf16 %v41_v24, %v40_v23  ;;  %v340_v28 = vpack.c.bf16 %v43_v27, %v42_v26  ;;  %v44_v29 = vld [vmem:[%s533_s2 + $0x70] sm:$0xff]  ;;  %v45_v30 = vld [vmem:[%s533_s2 + $0x78] sm:$0xff]  ;;  %v29_v32 = vld [vmem:[%s532_s1] sm:$0xff] }
   0xd   :  { %330 = vmatprep.subr.bf16.mxu0 %v385_v3  ;;  %350 = vmatpush3.bf16.msra.mxu1 %v349_v18  ;;  %v343_v31 = vpack.c.bf16 %v45_v30, %v44_v29  ;;  %v129_v33 = vld [vmem:[%s535_s4 + $0x20] sm:$0xff]  ;;  %v130_v34 = vld [vmem:[%s535_s4 + $0x28] sm:$0xff]  ;;  %v131_v36 = vld [vmem:[%s535_s4 + $0x30] sm:$0xff] }
   0xe   :  { %351 = vmatprep.subr.bf16.mxu1 %v385_v3  ;;  %v352_v35 = vpack.c.bf16 %v130_v34, %v129_v33  ;;  %v132_v37 = vld [vmem:[%s535_s4 + $0x38] sm:$0xff]  ;;  %v238_v39 = vld [vmem:[%s534_s3] ss:$0 sm:$0xff] }
   0xf   :  { %v355_v38 = vpack.c.bf16 %v132_v37, %v131_v36  ;;  %v239_v45 = vld [vmem:[%s536_s5] ss:$0 sm:$0xff]  ;;  %s388_s5 = smov [#allocation3]  }
  0x10   :  { %332 = vmatpush3.bf16.msra.mxu0 %v331_v19  ;;  %v216_v49 = vld [vmem:[%s537_s6] sm:$0xff]  ;;  %s230_s12 = sshll.u32 %s388_s5, 4  ;;  %s231_s12 = int_to_ptr.vmem [resolvable:$true] %s230_s12 }
  0x11   :  { %333 = vmatprep.subr.bf16.mxu0 %v385_v3  ;;  %353 = vmatpush3.bf16.msra.mxu1 %v352_v35  ;;  %v218_v54 = vmul.f32 %v217_v50, %v216_v49  ;;  %s361_s13 = scalar_lea.vmem %s231_s12, 128  ;;  %p366_p1 = scmp.lt.s32.totalorder %s231_s12, %s231_s12 }
  0x12   :  { %354 = vmatprep.subr.bf16.mxu1 %v385_v3  ;;  %p362_p0 = scmp.ne.s32.totalorder %s231_s12, %s361_s13  ;;  %p367_p2 = scmp.lt.s32.totalorder %s361_s13, %s361_s13 }
  0x14   :  { %335 = vmatpush3.bf16.msra.mxu0 %v334_v22  ;;  %p368_p3 = por %p367_p2, %p366_p1 }
  0x15   :  { %336 = vmatprep.subr.bf16.mxu0 %v385_v3  ;;  %356 = vmatpush3.bf16.msra.mxu1 %v355_v38 }
  0x16   :  { %p369_p4 = pnand %p368_p3, %p362_p0 }
  0x18   :  { %338 = vmatpush3.bf16.msra.mxu0 %v337_v25 }
  0x19   :  { %339 = vmatprep.subr.bf16.mxu0 %v385_v3 }
  0x1c   :  { %341 = vmatpush3.bf16.msra.mxu0 %v340_v28 }
  0x1d   :  { %342 = vmatprep.subr.bf16.mxu0 %v385_v3 }
  0x20   :  { %344 = vmatpush3.bf16.msra.mxu0 %v343_v31 }
  0x23   :  { %300 = vmatmul.mubr.f32.vlgmr.msra.gmra.mrb[0].mxu0 %v29_v32 }
  0xf6   :  { %v119_v40 = vpop.f32.mrb[0].mxu0 }
  0xf7   :  { %v120_v41 = vadd.f32 %v238_v39, %v119_v40  ;;  %v301_v42 = vpop.f32.mrb[1].mxu0 }
  0xf9   :  { %v123_v43 = vmul.f32 0.01, %v120_v41 }
  0xfb   :  { %v124_v44 = vmax.f32 %v120_v41, %v123_v43 }
  0xfd   :  { %319 = vmatmul.mubr.msk.f32.vlgmr.msra.gmra.mrb[0].mxu1 %vm140_vm1, %v124_v44 }
 0x1d0   :  { %v210_v46 = vpop.f32.mrb[0].mxu1 }
 0x1d1   :  { %v211_v47 = vadd.f32 %v239_v45, %v210_v46  ;;  %v320_v48 = vpop.f32.mrb[1].mxu1 }
 0x1d3   :  { %v214_v51 = vmul.f32 0.01, %v211_v47 }
 0x1d5   :  { %v215_v53 = vmax.f32 %v211_v47, %v214_v51 }
 0x1d7   :  { %v221_v55 = vmul.f32 %v220_v52, %v215_v53 }
 0x1d9   :  { %v222_v56 = vadd.f32 %v221_v55, %v218_v54 }
 0x1db   :  { %223 = vst [vmem:[#allocation3] sm:$0xff] %v222_v56 }
 0x1dc   :  { %372 = shalt.err (!%p369_p4)
}
 0x1dd   :  { %s373_s0 = scalar_lea.hbm %s538_s7, 128 }
 0x1de   :  { %p374_p5 = scmp.ne.s32.totalorder %s538_s7, %s373_s0  ;;  %p377_p6 = scmp.lt.u32.totalorder %s373_s0, %s538_s7 }
 0x1e0   :  { %p379_p7 = pnand %p377_p6, %p374_p5 }
 0x1e2   :  { %382 = shalt.err (!%p379_p7)
}
 0x1e3   :  { %233 = dma.vmem_to_hbm [thread:$0]  %s231_s12, 128, %s538_s7, [#allocation4]  }
 0x1e4   :  { %383 = dma.done.wait [#allocation4], 128  }
 0x1e5   :  { %384 = vsyncadd [#allocation4], 4294967168 }
 0x1e6   :  { %237 = vsyncpa [#allocation4], 1 }

</bundles_post_ra>
